<compile_context>
chip_gen: v6e
topology: v6e:2x2x1
jax: 0.10.0
libtpu: 0.0.40
codegen_flags: <defaults>
</compile_context>

<pallas_src>
import functools

import jax
import jax.numpy as jnp
from jax.experimental import pallas as pl
from jax.experimental.pallas import tpu as pltpu


# -----------------------------------------------------------------------------
# Single-step kernel (exact match of the module's forward()).
# -----------------------------------------------------------------------------
def _lstmcell_kernel(scene_ref, word_ref, h_ref, c_ref, w_ref, bias_ref,
                     h_out_ref, c_out_ref, x_scratch, *, rnn_size):
    R = rnn_size

    # Stage the three inputs into one (B, 4R) bf16 slab -> single MXU push.
    # Column boundaries (0, 2R, 3R) are multiples of 128 for R=128.
    x_scratch[:, 0:2 * R] = scene_ref[...]                      # already bf16
    x_scratch[:, 2 * R:3 * R] = word_ref[...]                   # already bf16
    x_scratch[:, 3 * R:4 * R] = h_ref[...].astype(jnp.bfloat16)

    sums = jnp.dot(x_scratch[...], w_ref[...],
                   preferred_element_type=jnp.float32)          # (B, 4R) f32
    sums = sums + bias_ref[...]                                 # (1, 4R) bcast

    c_prev = c_ref[...]                                         # (B, R) f32

    in_gate = jax.nn.sigmoid(sums[:, 0 * R:1 * R])
    forget_gate = jax.nn.sigmoid(sums[:, 1 * R:2 * R])
    out_gate = jax.nn.sigmoid(sums[:, 2 * R:3 * R])
    new_info = jnp.tanh(sums[:, 3 * R:4 * R])

    state_c = forget_gate * c_prev + in_gate * new_info
    state_h = out_gate * jnp.tanh(state_c)

    c_out_ref[...] = state_c.astype(c_out_ref.dtype)
    h_out_ref[...] = state_h.astype(h_out_ref.dtype)


@jax.jit
def two_inputs_lstmcell(scene_feats, word, state, params):
    """Pallas implementation of Two_inputs_lstmcell.forward (eval, mask=None)."""
    h0, c0 = state
    h_prev = h0[0]
    c_prev = c0[0]
    B, R = h_prev.shape

    w_all = params["w_all"]      # (4R, 4R) bf16, rows = [scene | word | hidden]
    bias = params["bias"]        # (1, 4R) f32 = bs + bw + bh

    scene_bf16 = scene_feats.astype(jnp.bfloat16)
    word_bf16 = word.astype(jnp.bfloat16)

    kernel = functools.partial(_lstmcell_kernel, rnn_size=R)
    vmem = pl.BlockSpec(memory_space=pltpu.MemorySpace.VMEM)

    cost = pl.CostEstimate(
        flops=2 * B * (4 * R) * (4 * R) + 10 * B * R,
        transcendentals=5 * B * R,
        bytes_accessed=((4 * R) * (4 * R) * 2          # bf16 weights
                        + 3 * R * B * 2                # bf16 scene+word
                        + 2 * B * R * 4                # f32 h, c in
                        + 4 * R * 4                    # bias
                        + 2 * B * R * 4),              # f32 h, c out
    )

    h_out, c_out = pl.pallas_call(
        kernel,
        out_shape=(
            jax.ShapeDtypeStruct((B, R), jnp.float32),
            jax.ShapeDtypeStruct((B, R), jnp.float32),
        ),
        in_specs=[vmem, vmem, vmem, vmem, vmem, vmem],
        out_specs=(vmem, vmem),
        scratch_shapes=[pltpu.VMEM((B, 4 * R), jnp.bfloat16)],
        input_output_aliases={2: 0, 3: 1},   # h_prev -> h_out, c_prev -> c_out
        cost_estimate=cost,
    )(scene_bf16, word_bf16, h_prev, c_prev, w_all, bias)

    output = h_out
    return output, (h_out[None, ...], c_out[None, ...])


# -----------------------------------------------------------------------------
# Sequence kernel: T cell steps inside one pallas_call (weights resident,
# h/c carried in VMEM scratch, non-recurrent projections hoisted outside).
# -----------------------------------------------------------------------------
def _lstm_seq_kernel(pre_ref, w_h_ref, h0_ref, c0_ref,
                     h_seq_ref, c_last_ref, h_state, c_state, *, rnn_size):
    R = rnn_size
    t = pl.program_id(0)

    @pl.when(t == 0)
    def _():
        h_state[...] = h0_ref[...]
        c_state[...] = c0_ref[...]

    # Only the recurrent matmul runs per step; scene/word partials are precomputed.
    sums = pre_ref[0] + jnp.dot(h_state[...].astype(jnp.bfloat16),
                                w_h_ref[...],
                                preferred_element_type=jnp.float32)

    in_gate = jax.nn.sigmoid(sums[:, 0 * R:1 * R])
    forget_gate = jax.nn.sigmoid(sums[:, 1 * R:2 * R])
    out_gate = jax.nn.sigmoid(sums[:, 2 * R:3 * R])
    new_info = jnp.tanh(sums[:, 3 * R:4 * R])

    state_c = forget_gate * c_state[...] + in_gate * new_info
    state_h = out_gate * jnp.tanh(state_c)

    c_state[...] = state_c
    h_state[...] = state_h
    h_seq_ref[0] = state_h

    @pl.when(t == pl.num_programs(0) - 1)
    def _():
        c_last_ref[...] = state_c


@jax.jit
def two_inputs_lstm_sequence(scene_feats, words, state, params):
    """Applies the cell over words[t] for t=0..T-1 (same scene_feats each step).

    Equivalent to calling two_inputs_lstmcell T times in a Python loop
    (eval mode, word_mask=None), but with the recurrence inside one kernel.
    """
    h0, c0 = state
    h_prev, c_prev = h0[0], c0[0]
    T, B, R = words.shape

    w_scene = params["w_scene"]   # (2R, 4R) bf16
    w_word = params["w_word"]     # (R, 4R)  bf16
    w_h = params["w_h"]           # (R, 4R)  bf16
    bias = params["bias"]         # (1, 4R)  f32

    # Hoist non-recurrent projections: one big MXU-efficient matmul over T*B rows.
    scene_proj = jnp.dot(scene_feats.astype(jnp.bfloat16), w_scene,
                         preferred_element_type=jnp.float32)            # (B, 4R)
    word_proj = jnp.dot(words.reshape(T * B, R).astype(jnp.bfloat16), w_word,
                        preferred_element_type=jnp.float32)
    pre = word_proj.reshape(T, B, 4 * R) + scene_proj[None] + bias       # (T,B,4R) f32

    kernel = functools.partial(_lstm_seq_kernel, rnn_size=R)

    cost = pl.CostEstimate(
        flops=T * (2 * B * R * 4 * R + 10 * B * R),
        transcendentals=T * 5 * B * R,
        bytes_accessed=(T * B * 4 * R * 4        # pre partials
                        + R * 4 * R * 2          # resident W_h (once)
                        + 2 * B * R * 4          # h0, c0
                        + T * B * R * 4          # h_seq out
                        + B * R * 4),            # c_last out
    )

    h_seq, c_last = pl.pallas_call(
        kernel,
        out_shape=(
            jax.ShapeDtypeStruct((T, B, R), jnp.float32),
            jax.ShapeDtypeStruct((B, R), jnp.float32),
        ),
        grid=(T,),
        in_specs=[
            pl.BlockSpec((1, B, 4 * R), lambda t: (t, 0, 0)),   # per-step partial
            pl.BlockSpec((R, 4 * R), lambda t: (0, 0)),         # resident weight
            pl.BlockSpec((B, R), lambda t: (0, 0)),             # h0
            pl.BlockSpec((B, R), lambda t: (0, 0)),             # c0
        ],
        out_specs=(
            pl.BlockSpec((1, B, R), lambda t: (t, 0, 0)),       # h per step
            pl.BlockSpec((B, R), lambda t: (0, 0)),             # final c
        ),
        scratch_shapes=[pltpu.VMEM((B, R), jnp.float32),        # h carry
                        pltpu.VMEM((B, R), jnp.float32)],       # c carry
        compiler_params=pltpu.CompilerParams(
            dimension_semantics=("arbitrary",)),
        cost_estimate=cost,
    )(pre, w_h, h_prev, c_prev)

    h_last = h_seq[-1]
    return h_seq, (h_last[None, ...], c_last[None, ...])


# -----------------------------------------------------------------------------
# Params + pure-JAX reference
# -----------------------------------------------------------------------------
def make_params(key, rnn_size):
    """Deterministic init matching the nn.Linear shapes; fused bf16 weights."""
    R = rnn_size
    ks = jax.random.split(key, 6)

    def lin(kw, kb, in_f, out_f):
        bound = 1.0 / jnp.sqrt(in_f)
        w = jax.random.uniform(kw, (out_f, in_f), jnp.float32, -bound, bound)
        b = jax.random.uniform(kb, (out_f,), jnp.float32, -bound, bound)
        return w.T, b  # transposed: (in_f, out_f)

    ws_t, bs = lin(ks[0], ks[1], 2 * R, 4 * R)
    ww_t, bw = lin(ks[2], ks[3], R, 4 * R)
    wh_t, bh = lin(ks[4], ks[5], R, 4 * R)

    w_scene = ws_t.astype(jnp.bfloat16)                       # (2R, 4R)
    w_word = ww_t.astype(jnp.bfloat16)                        # (R, 4R)
    w_h = wh_t.astype(jnp.bfloat16)                           # (R, 4R)
    w_all = jnp.concatenate([w_scene, w_word, w_h], axis=0)   # (4R, 4R)
    bias = (bs + bw + bh).reshape(1, 4 * R).astype(jnp.float32)
    return dict(w_all=w_all, w_scene=w_scene, w_word=w_word, w_h=w_h, bias=bias)


def reference_cell(scene_feats, word, h_prev, c_prev, params):
    """Pure-JAX f32 reference mirroring the PyTorch forward (eval, no mask)."""
    R = h_prev.shape[1]
    w = params["w_all"].astype(jnp.float32)
    sums = (scene_feats @ w[:2 * R] + word @ w[2 * R:3 * R]
            + h_prev @ w[3 * R:]) + params["bias"]
    in_g = jax.nn.sigmoid(sums[:, :R])
    f_g = jax.nn.sigmoid(sums[:, R:2 * R])
    o_g = jax.nn.sigmoid(sums[:, 2 * R:3 * R])
    new_info = jnp.tanh(sums[:, 3 * R:])
    state_c = f_g * c_prev + in_g * new_info
    state_h = o_g * jnp.tanh(state_c)
    return state_h, state_c


if __name__ == "__main__":
    rnn_size = 128
    batch = 8
    seq_len = 8

    key = jax.random.PRNGKey(0)
    kp, k1, k2, k3, k4, k5 = jax.random.split(key, 6)

    params = make_params(kp, rnn_size)
    scene = jax.random.normal(k1, (batch, 2 * rnn_size), jnp.float32)
    word = jax.random.normal(k2, (batch, rnn_size), jnp.float32)
    words = jax.random.normal(k5, (seq_len, batch, rnn_size), jnp.float32)
    h0 = jax.random.normal(k3, (1, batch, rnn_size), jnp.float32)
    c0 = jax.random.normal(k4, (1, batch, rnn_size), jnp.float32)

    # --- single step: exact match of the module's forward() ---
    out, (new_h, new_c) = two_inputs_lstmcell(scene, word, (h0, c0), params)
    jax.block_until_ready((out, new_h, new_c))

    ref_h, ref_c = reference_cell(scene, word, h0[0], c0[0], params)
    # Tolerance covers bf16 activation casts before the MXU dot (weights are
    # bf16 in both paths, accumulation f32 in both).
    assert jnp.allclose(out, ref_h, atol=3e-2, rtol=3e-2)
    assert jnp.allclose(new_c[0], ref_c, atol=3e-2, rtol=3e-2)

    # --- in-kernel sequence loop: amortizes weight DMA + launch overhead ---
    h_seq, (hT, cT) = two_inputs_lstm_sequence(scene, words, (h0, c0), params)
    jax.block_until_ready((h_seq, hT, cT))

    rh, rc = h0[0], c0[0]
    ref_seq = []
    for t in range(seq_len):
        rh, rc = reference_cell(scene, words[t], rh, rc, params)
        ref_seq.append(rh)
    ref_seq = jnp.stack(ref_seq)
    assert jnp.allclose(h_seq, ref_seq, atol=5e-2, rtol=5e-2)
    assert jnp.allclose(hT[0], rh, atol=5e-2, rtol=5e-2)
    assert jnp.allclose(cT[0], rc, atol=5e-2, rtol=5e-2)

    print("KERNEL_OK")
</pallas_src>

<mosaic_0001>
module attributes {stable_mosaic.version = 11 : i64} {
  func.func @_lstmcell_kernel(%arg0: memref<8x256xbf16, #tpu.memory_space<vmem>>, %arg1: memref<8x128xbf16, #tpu.memory_space<vmem>>, %arg2: memref<8x128xf32, #tpu.memory_space<vmem>>, %arg3: memref<8x128xf32, #tpu.memory_space<vmem>>, %arg4: memref<512x512xbf16, #tpu.memory_space<vmem>>, %arg5: memref<1x512xf32, #tpu.memory_space<vmem>>, %arg6: memref<8x128xf32, #tpu.memory_space<vmem>>, %arg7: memref<8x128xf32, #tpu.memory_space<vmem>>, %arg8: memref<8x512xbf16, #tpu.memory_space<vmem>>) attributes {dimension_semantics = [], scalar_prefetch = 0 : i64, scratch_operands = 1 : i64, tpu.core_type = #tpu.core_type<tc>} {
    %c0 = arith.constant 0 : index
    %c0_0 = arith.constant 0 : index
    %0 = vector.load %arg0[%c0, %c0_0] : memref<8x256xbf16, #tpu.memory_space<vmem>>, vector<8x256xbf16>
    %c0_1 = arith.constant 0 : index
    %c0_2 = arith.constant 0 : index
    %1 = vector.load %arg8[%c0_1, %c0_2] : memref<8x512xbf16, #tpu.memory_space<vmem>>, vector<8x256xbf16>
    tpu.vector_store %arg8[%c0_1, %c0_2], %0 {strides = array<i32>} : memref<8x512xbf16, #tpu.memory_space<vmem>>, vector<8x256xbf16>,
    %c0_3 = arith.constant 0 : index
    %c0_4 = arith.constant 0 : index
    %2 = vector.load %arg1[%c0_3, %c0_4] : memref<8x128xbf16, #tpu.memory_space<vmem>>, vector<8x128xbf16>
    %c0_5 = arith.constant 0 : index
    %c256 = arith.constant 256 : index
    %3 = vector.load %arg8[%c0_5, %c256] : memref<8x512xbf16, #tpu.memory_space<vmem>>, vector<8x128xbf16>
    tpu.vector_store %arg8[%c0_5, %c256], %2 {strides = array<i32>} : memref<8x512xbf16, #tpu.memory_space<vmem>>, vector<8x128xbf16>,
    %c0_6 = arith.constant 0 : index
    %c0_7 = arith.constant 0 : index
    %4 = vector.load %arg2[%c0_6, %c0_7] : memref<8x128xf32, #tpu.memory_space<vmem>>, vector<8x128xf32>
    %5 = arith.truncf %4 : vector<8x128xf32> to vector<8x128xbf16>
    %c0_8 = arith.constant 0 : index
    %c384 = arith.constant 384 : index
    %6 = vector.load %arg8[%c0_8, %c384] : memref<8x512xbf16, #tpu.memory_space<vmem>>, vector<8x128xbf16>
    tpu.vector_store %arg8[%c0_8, %c384], %5 {strides = array<i32>} : memref<8x512xbf16, #tpu.memory_space<vmem>>, vector<8x128xbf16>,
    %c0_9 = arith.constant 0 : index
    %c0_10 = arith.constant 0 : index
    %7 = vector.load %arg8[%c0_9, %c0_10] : memref<8x512xbf16, #tpu.memory_space<vmem>>, vector<8x512xbf16>
    %c0_11 = arith.constant 0 : index
    %c0_12 = arith.constant 0 : index
    %8 = vector.load %arg4[%c0_11, %c0_12] : memref<512x512xbf16, #tpu.memory_space<vmem>>, vector<512x512xbf16>
    %cst = arith.constant dense<0.000000e+00> : vector<8x512xf32>
    %9 = tpu.matmul %7, %8, %cst {dimension_numbers = #tpu.dot_dimension_numbers<[1], [0], [0], [1], [0, 0, 1, 1], [], []>} : vector<8x512xbf16>, vector<512x512xbf16>, vector<8x512xf32> -> vector<8x512xf32>
    %c0_13 = arith.constant 0 : index
    %c0_14 = arith.constant 0 : index
    %10 = vector.load %arg5[%c0_13, %c0_14] : memref<1x512xf32, #tpu.memory_space<vmem>>, vector<1x512xf32>
    %11 = vector.broadcast %10 : vector<1x512xf32> to vector<8x512xf32>
    %12 = arith.addf %9, %11 : vector<8x512xf32>
    %c0_15 = arith.constant 0 : index
    %c0_16 = arith.constant 0 : index
    %13 = vector.load %arg3[%c0_15, %c0_16] : memref<8x128xf32, #tpu.memory_space<vmem>>, vector<8x128xf32>
    %14 = vector.extract_strided_slice %12 {offsets = [0, 0], sizes = [8, 128], strides = [1, 1]} : vector<8x512xf32> to vector<8x128xf32>
    %15 = arith.negf %14 : vector<8x128xf32>
    %16 = math.exp %15 : vector<8x128xf32>
    %cst_17 = arith.constant 1.000000e+00 : f32
    %17 = vector.broadcast %cst_17 : f32 to vector<8x128xf32>
    %18 = arith.addf %17, %16 : vector<8x128xf32>
    %19 = arith.divf %17, %18 : vector<8x128xf32>
    %20 = vector.extract_strided_slice %12 {offsets = [0, 128], sizes = [8, 128], strides = [1, 1]} : vector<8x512xf32> to vector<8x128xf32>
    %21 = arith.negf %20 : vector<8x128xf32>
    %22 = math.exp %21 : vector<8x128xf32>
    %cst_18 = arith.constant 1.000000e+00 : f32
    %23 = vector.broadcast %cst_18 : f32 to vector<8x128xf32>
    %24 = arith.addf %23, %22 : vector<8x128xf32>
    %25 = arith.divf %23, %24 : vector<8x128xf32>
    %26 = vector.extract_strided_slice %12 {offsets = [0, 256], sizes = [8, 128], strides = [1, 1]} : vector<8x512xf32> to vector<8x128xf32>
    %27 = arith.negf %26 : vector<8x128xf32>
    %28 = math.exp %27 : vector<8x128xf32>
    %cst_19 = arith.constant 1.000000e+00 : f32
    %29 = vector.broadcast %cst_19 : f32 to vector<8x128xf32>
    %30 = arith.addf %29, %28 : vector<8x128xf32>
    %31 = arith.divf %29, %30 : vector<8x128xf32>
    %32 = vector.extract_strided_slice %12 {offsets = [0, 384], sizes = [8, 128], strides = [1, 1]} : vector<8x512xf32> to vector<8x128xf32>
    %33 = math.tanh %32 : vector<8x128xf32>
    %34 = arith.mulf %25, %13 : vector<8x128xf32>
    %35 = arith.mulf %19, %33 : vector<8x128xf32>
    %36 = arith.addf %34, %35 : vector<8x128xf32>
    %37 = math.tanh %36 : vector<8x128xf32>
    %38 = arith.mulf %31, %37 : vector<8x128xf32>
    %c0_20 = arith.constant 0 : index
    %c0_21 = arith.constant 0 : index
    %39 = vector.load %arg7[%c0_20, %c0_21] : memref<8x128xf32, #tpu.memory_space<vmem>>, vector<8x128xf32>
    tpu.vector_store %arg7[%c0_20, %c0_21], %36 {strides = array<i32>} : memref<8x128xf32, #tpu.memory_space<vmem>>, vector<8x128xf32>,
    %c0_22 = arith.constant 0 : index
    %c0_23 = arith.constant 0 : index
    %40 = vector.load %arg6[%c0_22, %c0_23] : memref<8x128xf32, #tpu.memory_space<vmem>>, vector<8x128xf32>
    tpu.vector_store %arg6[%c0_22, %c0_23], %38 {strides = array<i32>} : memref<8x128xf32, #tpu.memory_space<vmem>>, vector<8x128xf32>,
    return
  }
}

</mosaic_0001>

<bundles_post_ra>
// kernel: two_inputs_lstmcell.1
= control target key start
LH: loop header
LB: loop body
LE: loop exit
PB: predicated region body
PF: predicated region fallthrough
CT: control target
= control target key end

     0   :  { %13 = vsyncpa [#allocation4], 0  ;;  %s1424_s24 = smov [#allocation3]   ;;  %s1503_s0 = inlined_call_operand.vmem [shape: bf16[8,256], index: 0, kind: input, shape index: {}]   ;;  %s1504_s1 = inlined_call_operand.vmem [shape: bf16[8,128], index: 1, kind: input, shape index: {}]   ;;  %s1505_s2 = inlined_call_operand.vmem [shape: f32[8,128], index: 2, kind: input, shape index: {}, may-alias: {2,6}]   ;;  %s1506_s3 = inlined_call_operand.vmem [shape: f32[8,128], index: 3, kind: input, shape index: {}, may-alias: {3,7}]   ;;  %s1507_s4 = inlined_call_operand.hbm [shape: bf16[512,512], index: 4, kind: input, shape index: {}]   ;;  %s1508_s5 = inlined_call_operand.vmem [shape: f32[1,512], index: 5, kind: input, shape index: {}]   ;;  %s1509_s6 = inlined_call_operand.vmem [shape: f32[8,128], index: 6, kind: output, shape index: {0}, may-alias: {2,6}]   ;;  %s1510_s7 = inlined_call_operand.vmem [shape: f32[8,128], index: 7, kind: output, shape index: {1}, may-alias: {3,7}]  }
   0x1   :  { %s27_s25 = sshll.u32 %s1424_s24, 4  ;;  %s28_s25 = int_to_ptr.vmem [resolvable:$true] %s27_s25 }
   0x2   :  { %s1410_s26 = scalar_lea.vmem %s28_s25, 16384  ;;  %p1415_p1 = scmp.lt.s32.totalorder %s28_s25, %s28_s25 }
   0x3   :  { %p1411_p0 = scmp.ne.s32.totalorder %s28_s25, %s1410_s26  ;;  %p1416_p2 = scmp.lt.s32.totalorder %s1410_s26, %s1410_s26 }
   0x5   :  { %p1417_p3 = por %p1416_p2, %p1415_p1 }
   0x7   :  { %p1418_p4 = pnand %p1417_p3, %p1411_p0 }
   0x9   :  { %1421 = shalt.err (!%p1418_p4)
}
   0xa   :  { %s1425_s27 = smov 256   ;;  %s1426_s28 = smov 16  }
   0xb   :  { %33 = dma.hbm_to_vmem [thread:$0]  %s1507_s4, 16384, %s28_s25, [#allocation4], %s1425_s27, %s1425_s27, %s1426_s28  }
   0xc   :  { %1422 = dma.done.wait [#allocation4], 16384  }
   0xd   :  { %1423 = vsyncadd [#allocation4], 4294950912  ;;  %v1190_v0 = vld [vmem:[#allocation3 + $0xe4] ss:$16 sps:$4 sm:$0xff]   ;;  %v1194_v2 = vld [vmem:[#allocation3 + $0xe0] ss:$16 sps:$4 sm:$0xff]  }
   0xe   :  { %v1192_v1 = vld [vmem:[#allocation3 + $0x2e4] ss:$16 sps:$4 sm:$0xff]   ;;  %852 = vmatprep.subr.bf16.mxu0 %v1190_v0  ;;  %v1195_v3 = vld [vmem:[#allocation3 + $0x2e0] ss:$16 sps:$4 sm:$0xff]  }
   0xf   :  { %893 = vmatprep.subr.bf16.mxu1 %v1192_v1  ;;  %v1196_v4 = vld [vmem:[#allocation3 + $0xc4] ss:$16 sps:$4 sm:$0xff]   ;;  %853 = vmatpush1.bf16.msra.mxu0 %v1194_v2  ;;  %v1200_v6 = vld [vmem:[#allocation3 + $0xc0] ss:$16 sps:$4 sm:$0xff]  }
  0x10   :  { %894 = vmatpush1.bf16.msra.mxu1 %v1195_v3  ;;  %v1198_v5 = vld [vmem:[#allocation3 + $0x2c4] ss:$16 sps:$4 sm:$0xff]   ;;  %854 = vmatprep.subr.bf16.mxu0 %v1196_v4  ;;  %v1201_v7 = vld [vmem:[#allocation3 + $0x2c0] ss:$16 sps:$4 sm:$0xff]  }
  0x11   :  { %895 = vmatprep.subr.bf16.mxu1 %v1198_v5  ;;  %v1202_v8 = vld [vmem:[#allocation3 + $0xa4] ss:$16 sps:$4 sm:$0xff]   ;;  %v1206_v10 = vld [vmem:[#allocation3 + $0xa0] ss:$16 sps:$4 sm:$0xff]  }
  0x12   :  { %v1204_v9 = vld [vmem:[#allocation3 + $0x2a4] ss:$16 sps:$4 sm:$0xff]   ;;  %v1207_v11 = vld [vmem:[#allocation3 + $0x2a0] ss:$16 sps:$4 sm:$0xff]  }
  0x13   :  { %855 = vmatpush1.bf16.msra.mxu0 %v1200_v6  ;;  %v1208_v12 = vld [vmem:[#allocation3 + $0x84] ss:$16 sps:$4 sm:$0xff]   ;;  %v1212_v14 = vld [vmem:[#allocation3 + $0x80] ss:$16 sps:$4 sm:$0xff]  }
  0x14   :  { %896 = vmatpush1.bf16.msra.mxu1 %v1201_v7  ;;  %856 = vmatprep.subr.bf16.mxu0 %v1202_v8  ;;  %v1210_v13 = vld [vmem:[#allocation3 + $0x284] ss:$16 sps:$4 sm:$0xff]   ;;  %v1213_v15 = vld [vmem:[#allocation3 + $0x280] ss:$16 sps:$4 sm:$0xff]   ;;  %v1292_v7 = vld [vmem:[#allocation3 + $0xec] ss:$16 sps:$4 sm:$0xff]  }
  0x15   :  { %897 = vmatprep.subr.bf16.mxu1 %v1204_v9  ;;  %v1214_v16 = vld [vmem:[#allocation3 + $0x64] ss:$16 sps:$4 sm:$0xff]   ;;  %v1218_v18 = vld [vmem:[#allocation3 + $0x60] ss:$16 sps:$4 sm:$0xff]   ;;  %v1295_v8 = vld [vmem:[#allocation3 + $0x2ec] ss:$16 sps:$4 sm:$0xff]  }
  0x16   :  { %v1216_v17 = vld [vmem:[#allocation3 + $0x264] ss:$16 sps:$4 sm:$0xff]   ;;  %v1219_v19 = vld [vmem:[#allocation3 + $0x260] ss:$16 sps:$4 sm:$0xff]  }
  0x17   :  { %857 = vmatpush1.bf16.msra.mxu0 %v1206_v10  ;;  %v1220_v20 = vld [vmem:[#allocation3 + $0x44] ss:$16 sps:$4 sm:$0xff]   ;;  %v1224_v22 = vld [vmem:[#allocation3 + $0x40] ss:$16 sps:$4 sm:$0xff]  }
  0x18   :  { %898 = vmatpush1.bf16.msra.mxu1 %v1207_v11  ;;  %858 = vmatprep.subr.bf16.mxu0 %v1208_v12  ;;  %v1222_v21 = vld [vmem:[#allocation3 + $0x244] ss:$16 sps:$4 sm:$0xff]   ;;  %v1225_v23 = vld [vmem:[#allocation3 + $0x240] ss:$16 sps:$4 sm:$0xff]   ;;  %v1290_v11 = vld [vmem:[#allocation3 + $0xe8] ss:$16 sps:$4 sm:$0xff]  }
  0x19   :  { %899 = vmatprep.subr.bf16.mxu1 %v1210_v13  ;;  %v1226_v24 = vld [vmem:[#allocation3 + $0x24] ss:$16 sps:$4 sm:$0xff]   ;;  %v1230_v26 = vld [vmem:[#allocation3 + $0x20] ss:$16 sps:$4 sm:$0xff]   ;;  %v1293_v12 = vld [vmem:[#allocation3 + $0x2e8] ss:$16 sps:$4 sm:$0xff]  }
  0x1a   :  { %v1228_v25 = vld [vmem:[#allocation3 + $0x224] ss:$16 sps:$4 sm:$0xff]   ;;  %v1231_v27 = vld [vmem:[#allocation3 + $0x220] ss:$16 sps:$4 sm:$0xff]   ;;  %v1298_v13 = vld [vmem:[#allocation3 + $0xcc] ss:$16 sps:$4 sm:$0xff]  }
  0x1b   :  { %859 = vmatpush1.bf16.msra.mxu0 %v1212_v14  ;;  %v1232_v28 = vld [vmem:[#allocation3 + $0x4] ss:$16 sps:$4 sm:$0xff]   ;;  %v1236_v30 = vld [vmem:[#allocation3] ss:$16 sps:$4 sm:$0xff]   ;;  %v1301_v14 = vld [vmem:[#allocation3 + $0x2cc] ss:$16 sps:$4 sm:$0xff]  }
  0x1c   :  { %900 = vmatpush1.bf16.msra.mxu1 %v1213_v15  ;;  %860 = vmatprep.subr.bf16.mxu0 %v1214_v16  ;;  %v1234_v29 = vld [vmem:[#allocation3 + $0x204] ss:$16 sps:$4 sm:$0xff]   ;;  %v1237_v31 = vld [vmem:[#allocation3 + $0x200] ss:$16 sps:$4 sm:$0xff]   ;;  %v1296_v15 = vld [vmem:[#allocation3 + $0xc8] ss:$16 sps:$4 sm:$0xff]  }
  0x1d   :  { %901 = vmatprep.subr.bf16.mxu1 %v1216_v17  ;;  %v1238_v32 = vld [vmem:[#allocation3 + $0x1e4] ss:$16 sps:$4 sm:$0xff]   ;;  %v1242_v34 = vld [vmem:[#allocation3 + $0x1e0] ss:$16 sps:$4 sm:$0xff]   ;;  %v1299_v16 = vld [vmem:[#allocation3 + $0x2c8] ss:$16 sps:$4 sm:$0xff]  }
  0x1e   :  { %v1240_v33 = vld [vmem:[#allocation3 + $0x3e4] ss:$16 sps:$4 sm:$0xff]   ;;  %v1243_v35 = vld [vmem:[#allocation3 + $0x3e0] ss:$16 sps:$4 sm:$0xff]   ;;  %v1304_v17 = vld [vmem:[#allocation3 + $0xac] ss:$16 sps:$4 sm:$0xff]  }
  0x1f   :  { %861 = vmatpush1.bf16.msra.mxu0 %v1218_v18  ;;  %v1244_v36 = vld [vmem:[#allocation3 + $0x1c4] ss:$16 sps:$4 sm:$0xff]   ;;  %v1248_v38 = vld [vmem:[#allocation3 + $0x1c0] ss:$16 sps:$4 sm:$0xff]   ;;  %v1307_v18 = vld [vmem:[#allocation3 + $0x2ac] ss:$16 sps:$4 sm:$0xff]  }
  0x20   :  { %902 = vmatpush1.bf16.msra.mxu1 %v1219_v19  ;;  %862 = vmatprep.subr.bf16.mxu0 %v1220_v20  ;;  %v1246_v37 = vld [vmem:[#allocation3 + $0x3c4] ss:$16 sps:$4 sm:$0xff]   ;;  %v1249_v39 = vld [vmem:[#allocation3 + $0x3c0] ss:$16 sps:$4 sm:$0xff]   ;;  %v1302_v19 = vld [vmem:[#allocation3 + $0xa8] ss:$16 sps:$4 sm:$0xff]  }
  0x21   :  { %903 = vmatprep.subr.bf16.mxu1 %v1222_v21  ;;  %v1250_v40 = vld [vmem:[#allocation3 + $0x1a4] ss:$16 sps:$4 sm:$0xff]   ;;  %v1254_v42 = vld [vmem:[#allocation3 + $0x1a0] ss:$16 sps:$4 sm:$0xff]   ;;  %v1305_v20 = vld [vmem:[#allocation3 + $0x2a8] ss:$16 sps:$4 sm:$0xff]  }
  0x22   :  { %v1252_v41 = vld [vmem:[#allocation3 + $0x3a4] ss:$16 sps:$4 sm:$0xff]   ;;  %v1255_v43 = vld [vmem:[#allocation3 + $0x3a0] ss:$16 sps:$4 sm:$0xff]   ;;  %v1310_v21 = vld [vmem:[#allocation3 + $0x8c] ss:$16 sps:$4 sm:$0xff]  }
  0x23   :  { %863 = vmatpush1.bf16.msra.mxu0 %v1224_v22  ;;  %v1256_v44 = vld [vmem:[#allocation3 + $0x184] ss:$16 sps:$4 sm:$0xff]   ;;  %v1260_v46 = vld [vmem:[#allocation3 + $0x180] ss:$16 sps:$4 sm:$0xff]   ;;  %v1313_v22 = vld [vmem:[#allocation3 + $0x28c] ss:$16 sps:$4 sm:$0xff]  }
  0x24   :  { %904 = vmatpush1.bf16.msra.mxu1 %v1225_v23  ;;  %864 = vmatprep.subr.bf16.mxu0 %v1226_v24  ;;  %v1258_v45 = vld [vmem:[#allocation3 + $0x384] ss:$16 sps:$4 sm:$0xff]   ;;  %v41_v49 = vld [vmem:[%s1504_s1] sm:$0xf]  ;;  %v1308_v23 = vld [vmem:[#allocation3 + $0x88] ss:$16 sps:$4 sm:$0xff]  }
  0x25   :  { %905 = vmatprep.subr.bf16.mxu1 %v1228_v25  ;;  %v39_v47 = vld [vmem:[%s1503_s0] sm:$0xff]  ;;  %42 = vst [vmem:[#allocation2 + $0x8] sm:$0xf] %v41_v49  ;;  %v1311_v24 = vld [vmem:[#allocation3 + $0x288] ss:$16 sps:$4 sm:$0xff]  }
  0x26   :  { %v1473_v48 = vcombine.high %v39_v47, %v39_v47  ;;  %v43_v50 = vld [vmem:[%s1505_s2] sm:$0xff]  ;;  %v1482_v9 = vcombine.low %v39_v47, %v39_v47  ;;  %v1316_v25 = vld [vmem:[#allocation3 + $0x6c] ss:$16 sps:$4 sm:$0xff]   ;;  %v1344_v47 = vld [vmem:[#allocation3 + $0x1c8] ss:$16 sps:$4 sm:$0xff]  }
  0x27   :  { %865 = vmatpush1.bf16.msra.mxu0 %v1230_v26  ;;  %v1261_v51 = vld [vmem:[#allocation3 + $0x380] ss:$16 sps:$4 sm:$0xff]   ;;  %v1262_v52 = vld [vmem:[#allocation3 + $0x164] ss:$16 sps:$4 sm:$0xff]   ;;  %v44_v53 = vpack.c.bf16 %v43_v50, %v43_v50  ;;  %v1319_v26 = vld [vmem:[#allocation3 + $0x26c] ss:$16 sps:$4 sm:$0xff]  }
  0x28   :  { %906 = vmatpush1.bf16.msra.mxu1 %v1231_v27  ;;  %866 = vmatprep.subr.bf16.mxu0 %v1232_v28  ;;  %v1264_v54 = vld [vmem:[#allocation3 + $0x364] ss:$16 sps:$4 sm:$0xff]   ;;  %v1266_v55 = vld [vmem:[#allocation3 + $0x160] ss:$16 sps:$4 sm:$0xff]   ;;  %v1314_v27 = vld [vmem:[#allocation3 + $0x68] ss:$16 sps:$4 sm:$0xff]  }
  0x29   :  { %907 = vmatprep.subr.bf16.mxu1 %v1234_v29  ;;  %884 = vmatprep.mubr.bf16.mxu0 %v1473_v48  ;;  %45 = vst [vmem:[#allocation2 + $0xc] sm:$0xf] %v44_v53  ;;  %v1267_v56 = vld [vmem:[#allocation3 + $0x360] ss:$16 sps:$4 sm:$0xff]   ;;  %v1268_v57 = vld [vmem:[#allocation3 + $0x144] ss:$16 sps:$4 sm:$0xff]  }
  0x2a   :  { %v1270_v58 = vld [vmem:[#allocation3 + $0x344] ss:$16 sps:$4 sm:$0xff]   ;;  %v1272_v59 = vld [vmem:[#allocation3 + $0x140] ss:$16 sps:$4 sm:$0xff]   ;;  %v1317_v28 = vld [vmem:[#allocation3 + $0x268] ss:$16 sps:$4 sm:$0xff]  }
  0x2b   :  { %867 = vmatpush1.bf16.msra.mxu0 %v1236_v30  ;;  %v1273_v60 = vld [vmem:[#allocation3 + $0x340] ss:$16 sps:$4 sm:$0xff]   ;;  %v1274_v61 = vld [vmem:[#allocation3 + $0x124] ss:$16 sps:$4 sm:$0xff]   ;;  %v1322_v29 = vld [vmem:[#allocation3 + $0x4c] ss:$16 sps:$4 sm:$0xff]  }
  0x2c   :  { %908 = vmatpush1.bf16.msra.mxu1 %v1237_v31  ;;  %868 = vmatprep.subr.bf16.mxu0 %v1238_v32  ;;  %v1276_v62 = vld [vmem:[#allocation3 + $0x324] ss:$16 sps:$4 sm:$0xff]   ;;  %v1278_v1 = vld [vmem:[#allocation3 + $0x120] ss:$16 sps:$4 sm:$0xff]   ;;  %v1325_v30 = vld [vmem:[#allocation3 + $0x24c] ss:$16 sps:$4 sm:$0xff]  }
  0x2d   :  { %909 = vmatprep.subr.bf16.mxu1 %v1240_v33  ;;  %v1279_v2 = vld [vmem:[#allocation3 + $0x320] ss:$16 sps:$4 sm:$0xff]   ;;  %v1280_v3 = vld [vmem:[#allocation3 + $0x104] ss:$16 sps:$4 sm:$0xff]   ;;  %v1320_v31 = vld [vmem:[#allocation3 + $0x48] ss:$16 sps:$4 sm:$0xff]  }
  0x2e   :  { %v1282_v4 = vld [vmem:[#allocation3 + $0x304] ss:$16 sps:$4 sm:$0xff]   ;;  %v1284_v5 = vld [vmem:[#allocation3 + $0x100] ss:$16 sps:$4 sm:$0xff]   ;;  %v1323_v32 = vld [vmem:[#allocation3 + $0x248] ss:$16 sps:$4 sm:$0xff]  }
  0x2f   :  { %869 = vmatpush2.bf16.msra.mxu0 %v1242_v34  ;;  %v1285_v6 = vld [vmem:[#allocation3 + $0x300] ss:$16 sps:$4 sm:$0xff]   ;;  %v1328_v33 = vld [vmem:[#allocation3 + $0x2c] ss:$16 sps:$4 sm:$0xff]  }
  0x30   :  { %910 = vmatpush2.bf16.msra.mxu1 %v1243_v35  ;;  %870 = vmatprep.subr.bf16.mxu0 %v1244_v36  ;;  %v47_v63 = vld [vmem:[#allocation2 + $0x8] sm:$0xff] }
  0x31   :  { %911 = vmatprep.subr.bf16.mxu1 %v1246_v37  ;;  %v1055_v0 = vcombine.high %v47_v63, %v47_v63  ;;  %v1484_v10 = vcombine.low %v47_v63, %v47_v63  ;;  %v1331_v34 = vld [vmem:[#allocation3 + $0x22c] ss:$16 sps:$4 sm:$0xff]   ;;  %v1326_v35 = vld [vmem:[#allocation3 + $0x28] ss:$16 sps:$4 sm:$0xff]  }
  0x32   :  { %v1329_v36 = vld [vmem:[#allocation3 + $0x228] ss:$16 sps:$4 sm:$0xff]   ;;  %v1334_v37 = vld [vmem:[#allocation3 + $0xc] ss:$16 sps:$4 sm:$0xff]  }
  0x33   :  { %871 = vmatpush2.bf16.msra.mxu0 %v1248_v38  ;;  %925 = vmatprep.mubr.bf16.mxu1 %v1055_v0  ;;  %v1337_v38 = vld [vmem:[#allocation3 + $0x20c] ss:$16 sps:$4 sm:$0xff]   ;;  %v1368_v63 = vld [vmem:[#allocation3 + $0x148] ss:$16 sps:$4 sm:$0xff]  }
  0x34   :  { %912 = vmatpush2.bf16.msra.mxu1 %v1249_v39  ;;  %872 = vmatprep.subr.bf16.mxu0 %v1250_v40  ;;  %v1332_v39 = vld [vmem:[#allocation3 + $0x8] ss:$16 sps:$4 sm:$0xff]   ;;  %v1352_v49 = vld [vmem:[#allocation3 + $0x1ac] ss:$16 sps:$4 sm:$0xff]  }
  0x35   :  { %913 = vmatprep.subr.bf16.mxu1 %v1252_v41  ;;  %v1335_v40 = vld [vmem:[#allocation3 + $0x208] ss:$16 sps:$4 sm:$0xff]   ;;  %v1340_v41 = vld [vmem:[#allocation3 + $0x1ec] ss:$16 sps:$4 sm:$0xff]  }
  0x36   :  { %v1355_v50 = vld [vmem:[#allocation3 + $0x3ac] ss:$16 sps:$4 sm:$0xff]  }
  0x37   :  { %873 = vmatpush2.bf16.msra.mxu0 %v1254_v42  ;;  %v1343_v42 = vld [vmem:[#allocation3 + $0x3ec] ss:$16 sps:$4 sm:$0xff]  }
  0x38   :  { %914 = vmatpush2.bf16.msra.mxu1 %v1255_v43  ;;  %874 = vmatprep.subr.bf16.mxu0 %v1256_v44  ;;  %v1338_v43 = vld [vmem:[#allocation3 + $0x1e8] ss:$16 sps:$4 sm:$0xff]   ;;  %v1358_v53 = vld [vmem:[#allocation3 + $0x18c] ss:$16 sps:$4 sm:$0xff]  }
  0x39   :  { %915 = vmatprep.subr.bf16.mxu1 %v1258_v45  ;;  %v1341_v44 = vld [vmem:[#allocation3 + $0x3e8] ss:$16 sps:$4 sm:$0xff]   ;;  %v1346_v45 = vld [vmem:[#allocation3 + $0x1cc] ss:$16 sps:$4 sm:$0xff]  }
  0x3b   :  { %875 = vmatpush2.bf16.msra.mxu0 %v1260_v46  ;;  %v1349_v46 = vld [vmem:[#allocation3 + $0x3cc] ss:$16 sps:$4 sm:$0xff]  }
  0x3c   :  { %916 = vmatpush2.bf16.msra.mxu1 %v1261_v51  ;;  %876 = vmatprep.subr.bf16.mxu0 %v1262_v52  ;;  %v1350_v51 = vld [vmem:[#allocation3 + $0x1a8] ss:$16 sps:$4 sm:$0xff]  }
  0x3d   :  { %917 = vmatprep.subr.bf16.mxu1 %v1264_v54  ;;  %v1353_v52 = vld [vmem:[#allocation3 + $0x3a8] ss:$16 sps:$4 sm:$0xff]   ;;  %v1361_v54 = vld [vmem:[#allocation3 + $0x38c] ss:$16 sps:$4 sm:$0xff]  }
  0x3f   :  { %877 = vmatpush2.bf16.msra.mxu0 %v1266_v55  ;;  %v1356_v55 = vld [vmem:[#allocation3 + $0x188] ss:$16 sps:$4 sm:$0xff]  }
  0x40   :  { %918 = vmatpush2.bf16.msra.mxu1 %v1267_v56  ;;  %878 = vmatprep.subr.bf16.mxu0 %v1268_v57  ;;  %v1359_v56 = vld [vmem:[#allocation3 + $0x388] ss:$16 sps:$4 sm:$0xff]   ;;  %v1364_v57 = vld [vmem:[#allocation3 + $0x16c] ss:$16 sps:$4 sm:$0xff]  }
  0x41   :  { %919 = vmatprep.subr.bf16.mxu1 %v1270_v58  ;;  %v1367_v58 = vld [vmem:[#allocation3 + $0x36c] ss:$16 sps:$4 sm:$0xff]  }
  0x43   :  { %879 = vmatpush2.bf16.msra.mxu0 %v1272_v59  ;;  %v1362_v59 = vld [vmem:[#allocation3 + $0x168] ss:$16 sps:$4 sm:$0xff]  }
  0x44   :  { %920 = vmatpush2.bf16.msra.mxu1 %v1273_v60  ;;  %880 = vmatprep.subr.bf16.mxu0 %v1274_v61  ;;  %v1365_v60 = vld [vmem:[#allocation3 + $0x368] ss:$16 sps:$4 sm:$0xff]   ;;  %v1370_v61 = vld [vmem:[#allocation3 + $0x14c] ss:$16 sps:$4 sm:$0xff]  }
  0x45   :  { %921 = vmatprep.subr.bf16.mxu1 %v1276_v62  ;;  %v1373_v62 = vld [vmem:[#allocation3 + $0x34c] ss:$16 sps:$4 sm:$0xff]  }
  0x47   :  { %881 = vmatpush2.bf16.msra.mxu0 %v1278_v1  ;;  %v1376_v1 = vld [vmem:[#allocation3 + $0x12c] ss:$16 sps:$4 sm:$0xff]  }
  0x48   :  { %922 = vmatpush2.bf16.msra.mxu1 %v1279_v2  ;;  %882 = vmatprep.subr.bf16.mxu0 %v1280_v3  ;;  %v1379_v2 = vld [vmem:[#allocation3 + $0x32c] ss:$16 sps:$4 sm:$0xff]   ;;  %v1374_v3 = vld [vmem:[#allocation3 + $0x128] ss:$16 sps:$4 sm:$0xff]  }
  0x49   :  { %923 = vmatprep.subr.bf16.mxu1 %v1282_v4  ;;  %v1377_v4 = vld [vmem:[#allocation3 + $0x328] ss:$16 sps:$4 sm:$0xff]  }
  0x4b   :  { %883 = vmatpush2.bf16.msra.mxu0 %v1284_v5  ;;  %v1382_v5 = vld [vmem:[#allocation3 + $0x10c] ss:$16 sps:$4 sm:$0xff]  }
  0x4c   :  { %924 = vmatpush2.bf16.msra.mxu1 %v1285_v6  ;;  %934 = vmatprep.subr.bf16.mxu0 %v1292_v7  ;;  %v1385_v6 = vld [vmem:[#allocation3 + $0x30c] ss:$16 sps:$4 sm:$0xff]   ;;  %v1380_v7 = vld [vmem:[#allocation3 + $0x108] ss:$16 sps:$4 sm:$0xff]  }
  0x4d   :  { %975 = vmatprep.subr.bf16.mxu1 %v1295_v8  ;;  %v1383_v8 = vld [vmem:[#allocation3 + $0x308] ss:$16 sps:$4 sm:$0xff]  }
  0x4e   :  { %885 = vmatmul.mubr.bf16.vlgmr.msra.gmra.mxu0 %v1482_v9 }
  0x4f   :  { %926 = vmatmul.mubr.bf16.vlgmr.msra.gmra.mxu1 %v1484_v10  ;;  %935 = vmatpush1.bf16.msra.mxu0 %v1290_v11 }
  0x50   :  { %976 = vmatpush1.bf16.msra.mxu1 %v1293_v12  ;;  %936 = vmatprep.subr.bf16.mxu0 %v1298_v13 }
  0x51   :  { %977 = vmatprep.subr.bf16.mxu1 %v1301_v14  ;;  %966 = vmatprep.mubr.bf16.mxu0 %v1473_v48  ;;  %v1347_v48 = vld [vmem:[#allocation3 + $0x3c8] ss:$16 sps:$4 sm:$0xff]  }
  0x52   :  { %1007 = vmatprep.mubr.bf16.mxu1 %v1055_v0  ;;  %v1371_v0 = vld [vmem:[#allocation3 + $0x348] ss:$16 sps:$4 sm:$0xff]  }
  0x53   :  { %937 = vmatpush1.bf16.msra.mxu0 %v1296_v15 }
  0x54   :  { %978 = vmatpush1.bf16.msra.mxu1 %v1299_v16  ;;  %938 = vmatprep.subr.bf16.mxu0 %v1304_v17 }
  0x55   :  { %979 = vmatprep.subr.bf16.mxu1 %v1307_v18 }
  0x57   :  { %939 = vmatpush1.bf16.msra.mxu0 %v1302_v19  ;;  %v178_v19 = vlaneseq }
  0x58   :  { %980 = vmatpush1.bf16.msra.mxu1 %v1305_v20  ;;  %940 = vmatprep.subr.bf16.mxu0 %v1310_v21 }
  0x59   :  { %981 = vmatprep.subr.bf16.mxu1 %v1313_v22  ;;  %v179_v20 = vshrl.u32 %v178_v19, 7  ;;  %v176_v22 = vld [vmem:[%s1508_s5] sm:$0xf] }
  0x5b   :  { %941 = vmatpush1.bf16.msra.mxu0 %v1308_v23  ;;  %v180_v21 = vsub.s32 0, %v179_v20  ;;  %v184_v23 = vsub.s32 1, %v179_v20 }
  0x5c   :  { %982 = vmatpush1.bf16.msra.mxu1 %v1311_v24  ;;  %942 = vmatprep.subr.bf16.mxu0 %v1316_v25 }
  0x5d   :  { %983 = vmatprep.subr.bf16.mxu1 %v1319_v26  ;;  %v181_v24 = vrot.slane %v176_v22, %v180_v21 }
  0x5f   :  { %943 = vmatpush1.bf16.msra.mxu0 %v1314_v27 }
  0x60   :  { %984 = vmatpush1.bf16.msra.mxu1 %v1317_v28  ;;  %944 = vmatprep.subr.bf16.mxu0 %v1322_v29 }
  0x61   :  { %985 = vmatprep.subr.bf16.mxu1 %v1325_v30  ;;  %v188_v30 = vsub.s32 2, %v179_v20 }
  0x63   :  { %945 = vmatpush1.bf16.msra.mxu0 %v1320_v31  ;;  %v192_v31 = vsub.s32 3, %v179_v20 }
  0x64   :  { %986 = vmatpush1.bf16.msra.mxu1 %v1323_v32  ;;  %946 = vmatprep.subr.bf16.mxu0 %v1328_v33  ;;  %v189_v32 = vrot.slane %v176_v22, %v188_v30 }
  0x65   :  { %987 = vmatprep.subr.bf16.mxu1 %v1331_v34 }
  0x67   :  { %947 = vmatpush1.bf16.msra.mxu0 %v1326_v35  ;;  %v193_v35 = vrot.slane %v176_v22, %v192_v31 }
  0x68   :  { %988 = vmatpush1.bf16.msra.mxu1 %v1329_v36  ;;  %948 = vmatprep.subr.bf16.mxu0 %v1334_v37 }
  0x69   :  { %989 = vmatprep.subr.bf16.mxu1 %v1337_v38 }
  0x6b   :  { %949 = vmatpush1.bf16.msra.mxu0 %v1332_v39 }
  0x6c   :  { %990 = vmatpush1.bf16.msra.mxu1 %v1335_v40  ;;  %950 = vmatprep.subr.bf16.mxu0 %v1340_v41 }
  0x6d   :  { %991 = vmatprep.subr.bf16.mxu1 %v1343_v42 }
  0x6f   :  { %951 = vmatpush2.bf16.msra.mxu0 %v1338_v43 }
  0x70   :  { %992 = vmatpush2.bf16.msra.mxu1 %v1341_v44  ;;  %952 = vmatprep.subr.bf16.mxu0 %v1346_v45 }
  0x71   :  { %993 = vmatprep.subr.bf16.mxu1 %v1349_v46 }
  0x73   :  { %953 = vmatpush2.bf16.msra.mxu0 %v1344_v47 }
  0x74   :  { %994 = vmatpush2.bf16.msra.mxu1 %v1347_v48  ;;  %954 = vmatprep.subr.bf16.mxu0 %v1352_v49 }
  0x75   :  { %995 = vmatprep.subr.bf16.mxu1 %v1355_v50 }
  0x77   :  { %955 = vmatpush2.bf16.msra.mxu0 %v1350_v51 }
  0x78   :  { %996 = vmatpush2.bf16.msra.mxu1 %v1353_v52  ;;  %956 = vmatprep.subr.bf16.mxu0 %v1358_v53  ;;  %v1016_v53 = vld [vmem:[%s1506_s3] sm:$0xff] }
  0x79   :  { %997 = vmatprep.subr.bf16.mxu1 %v1361_v54 }
  0x7b   :  { %957 = vmatpush2.bf16.msra.mxu0 %v1356_v55 }
  0x7c   :  { %998 = vmatpush2.bf16.msra.mxu1 %v1359_v56  ;;  %958 = vmatprep.subr.bf16.mxu0 %v1364_v57 }
  0x7d   :  { %999 = vmatprep.subr.bf16.mxu1 %v1367_v58 }
  0x7f   :  { %959 = vmatpush2.bf16.msra.mxu0 %v1362_v59 }
  0x80   :  { %1000 = vmatpush2.bf16.msra.mxu1 %v1365_v60  ;;  %960 = vmatprep.subr.bf16.mxu0 %v1370_v61 }
  0x81   :  { %1001 = vmatprep.subr.bf16.mxu1 %v1373_v62 }
  0x83   :  { %961 = vmatpush2.bf16.msra.mxu0 %v1368_v63 }
  0x84   :  { %1002 = vmatpush2.bf16.msra.mxu1 %v1371_v0  ;;  %962 = vmatprep.subr.bf16.mxu0 %v1376_v1 }
  0x85   :  { %1003 = vmatprep.subr.bf16.mxu1 %v1379_v2 }
  0x87   :  { %963 = vmatpush2.bf16.msra.mxu0 %v1374_v3 }
  0x88   :  { %1004 = vmatpush2.bf16.msra.mxu1 %v1377_v4  ;;  %964 = vmatprep.subr.bf16.mxu0 %v1382_v5 }
  0x89   :  { %1005 = vmatprep.subr.bf16.mxu1 %v1385_v6 }
  0x8b   :  { %965 = vmatpush2.bf16.msra.mxu0 %v1380_v7 }
  0x8c   :  { %1006 = vmatpush2.bf16.msra.mxu1 %v1383_v8 }
  0x8e   :  { %967 = vmatmul.mubr.bf16.vlgmr.msra.gmra.mxu0 %v1482_v9  ;;  %v185_v9 = vrot.slane %v176_v22, %v184_v23 }
  0x8f   :  { %1008 = vmatmul.mubr.bf16.vlgmr.msra.gmra.mxu1 %v1484_v10 }
 0x10e   :  { %v886_v11 = vpop.f32.mrf.mxu0 }
 0x10f   :  { %v927_v12 = vpop.f32.mrf.mxu1  ;;  %v887_v25 = vadd.f32 %v886_v11, %v181_v24 }
 0x110   :  { %v888_v13 = vpop.f32.mrf.mxu0 }
 0x111   :  { %v929_v14 = vpop.f32.mrf.mxu1  ;;  %v889_v10 = vadd.f32 %v888_v13, %v185_v9  ;;  %v928_v26 = vadd.f32 %v927_v12, %v887_v25 }
 0x112   :  { %v890_v15 = vpop.f32.mrf.mxu0 }
 0x113   :  { %v931_v16 = vpop.f32.mrf.mxu1  ;;  %v930_v27 = vadd.f32 %v929_v14, %v889_v10  ;;  %v1184_v28 = vmul.f32 -1.442695, %v928_v26 }
 0x114   :  { %v891_v17 = vpop.f32.mrf.mxu0 }
 0x115   :  { %v932_v18 = vpop.f32.mrf.mxu1  ;;  %v1185_v29 = vmul.f32 -1.442695, %v930_v27  ;;  %1386 = vpow2.f32 %v1184_v28 }
 0x117   :  { %1388 = vpow2.f32 %v1185_v29 }
 0x122   :  { %v1387_v33 = vpop.eup %1386 }
 0x123   :  { %v1020_v38 = vadd.f32 1.0, %v1387_v33 }
 0x124   :  { %v1389_v34 = vpop.eup %1388 }
 0x125   :  { %v1026_v40 = vadd.f32 1.0, %v1389_v34  ;;  %1390 = vrcp.f32 %v1020_v38 }
 0x127   :  { %1392 = vrcp.f32 %v1026_v40 }
 0x132   :  { %v1391_v51 = vpop.eup %1390 }
 0x134   :  { %v1393_v52 = vpop.eup %1392 }
 0x135   :  { %v1036_v57 = vmul.f32 %v1393_v52, %v1016_v53 }
 0x14e   :  { %v968_v36 = vpop.f32.mrf.mxu0 }
 0x14f   :  { %v1009_v37 = vpop.f32.mrf.mxu1  ;;  %v969_v39 = vadd.f32 %v968_v36, %v189_v32 }
 0x150   :  { %v970_v41 = vpop.f32.mrf.mxu0 }
 0x151   :  { %v1011_v42 = vpop.f32.mrf.mxu1  ;;  %v1010_v43 = vadd.f32 %v1009_v37, %v969_v39  ;;  %v971_v44 = vadd.f32 %v970_v41, %v193_v35 }
 0x152   :  { %v972_v45 = vpop.f32.mrf.mxu0 }
 0x153   :  { %v1013_v46 = vpop.f32.mrf.mxu1  ;;  %v1186_v47 = vmul.f32 -1.442695, %v1010_v43  ;;  %v1012_v48 = vadd.f32 %v1011_v42, %v971_v44 }
 0x154   :  { %v973_v49 = vpop.f32.mrf.mxu0 }
 0x155   :  { %v1014_v50 = vpop.f32.mrf.mxu1  ;;  %1394 = vpow2.f32 %v1186_v47 }
 0x156   :  { %1396 = vtanh.f32 %v1012_v48 }
 0x162   :  { %v1395_v54 = vpop.eup %1394 }
 0x163   :  { %v1397_v55 = vpop.eup %1396  ;;  %v1032_v56 = vadd.f32 1.0, %v1395_v54 }
 0x164   :  { %v1037_v58 = vmul.f32 %v1397_v55, %v1391_v51 }
 0x165   :  { %1398 = vrcp.f32 %v1032_v56 }
 0x166   :  { %v1038_v59 = vadd.f32 %v1037_v58, %v1036_v57 }
 0x168   :  { %1400 = vtanh.f32 %v1038_v59  ;;  %1041 = vst [vmem:[%s1510_s7] sm:$0xff] %v1038_v59 }
 0x172   :  { %v1399_v60 = vpop.eup %1398 }
 0x175   :  { %v1401_v61 = vpop.eup %1400 }
 0x176   :  { %v1040_v62 = vmul.f32 %v1401_v61, %v1399_v60 }
 0x178   :  { %1042 = vst [vmem:[%s1509_s6] sm:$0xff] %v1040_v62 }
 0x179   :  { %1051 = vsyncpa [#allocation4], 1 }

</bundles_post_ra>
